<compile_context>
chip_gen: v7x
topology: tpu7x:2x2x1
jax: 0.10.0
libtpu: 0.0.40
codegen_flags: <defaults>
</compile_context>

<pallas_src>
import functools

import jax
import jax.numpy as jnp
from jax import lax
from jax.experimental import pallas as pl
from jax.experimental.pallas import tpu as pltpu


def rwkv7_ffn_kernel(x_ref, xprev_ref, params_ref, kw_ref, vw_ref,
                     out_ref, state_out_ref, xk_ref, acc_ref, *, compute_dtype):
    s_idx = pl.program_id(0)
    k_idx = pl.program_id(1)

    # ---- per-S-tile prologue: LayerNorm, token shift, xk, residual init ----
    @pl.when(k_idx == 0)
    def _():
        x = x_ref[...].astype(jnp.float32)                     # (tS, H)
        state = params_ref[0:1, :]                             # (1, H) f32
        x_k = params_ref[1:2, :]
        ln_w = params_ref[2:3, :]
        ln_b = params_ref[3:4, :]

        def layernorm(v):
            mean = jnp.mean(v, axis=-1, keepdims=True)
            cent = v - mean
            var = jnp.mean(cent * cent, axis=-1, keepdims=True)
            return cent * lax.rsqrt(var + 1e-5) * ln_w + ln_b

        xn = layernorm(x)                                      # (tS, H)

        # token shift: past[t] = xn[t-1]; past[0] = state (tile 0) or
        # LayerNorm of the previous tile's last raw x row (tiles > 0).
        shifted = pltpu.roll(xn, shift=1, axis=0)              # row 0 garbage
        prev_x = xprev_ref[0].astype(jnp.float32)              # (1, H)
        prev_row = jnp.where(s_idx == 0, state, layernorm(prev_x))
        row = lax.broadcasted_iota(jnp.int32, xn.shape, 0)
        past = jnp.where(row == 0, prev_row, shifted)
        xk = xn + (past - xn) * x_k                            # (tS, H)

        xk_ref[...] = xk.astype(compute_dtype)                 # kept across I tiles
        acc_ref[...] = x                                       # residual folded in
        state_out_ref[0] = xn[-1:, :].astype(state_out_ref.dtype)

    # ---- per-I-tile matmuls (MXU, bf16 in / f32 accumulate) ----
    xk_c = xk_ref[...]                                         # (tS, H)
    kw = kw_ref[...]                                           # (tI, H) torch layout
    vw = vw_ref[...]                                           # (H, tI) torch layout

    # key_tile = relu(xk @ kw.T)^2                             -> (tS, tI)
    kk = lax.dot_general(xk_c, kw, dimension_numbers=(((1,), (1,)), ((), ())),
                         preferred_element_type=jnp.float32)
    kk = jnp.maximum(kk, 0.0)
    kk = kk * kk

    # value partial = key_tile @ vw.T                          -> (tS, H)
    v_part = lax.dot_general(kk.astype(compute_dtype), vw,
                             dimension_numbers=(((1,), (1,)), ((), ())),
                             preferred_element_type=jnp.float32)
    acc_ref[...] += v_part

    @pl.when(k_idx == pl.num_programs(1) - 1)
    def _():
        out_ref[...] = acc_ref[...].astype(out_ref.dtype)


def _pick_tile(dim, candidates):
    for t in candidates:
        if t <= dim and dim % t == 0:
            return t
    return dim


def rwkv7_ffn(x, state, x_k, ln_w, ln_b, key_w, value_w, *,
              block_s=None, block_i=None, compute_dtype=jnp.bfloat16):
    """x: (1, S, H); state: (1, H); key_w: (I, H); value_w: (H, I) (torch layout)."""
    B, S, H = x.shape
    assert B == 1, "module asserts batch_size == 1 on this path"
    I = key_w.shape[0]
    assert key_w.shape == (I, H) and value_w.shape == (H, I)

    tS = block_s or _pick_tile(S, (256, 128, 64, 32, 16, 8))
    tI = block_i or _pick_tile(I, (1024, 512, 256, 128))   # <=1024 keeps v7x 64MiB happy
    assert S % tS == 0 and I % tI == 0
    ns, nk = S // tS, I // tI

    x2 = x[0]                                                # (S, H)

    # Small packed params block: [state, x_k, ln_w, ln_b], kept in f32 for LN math.
    params = jnp.stack([state.reshape(H), x_k.reshape(H),
                        ln_w.reshape(H), ln_b.reshape(H)]).astype(jnp.float32)

    # Previous raw x row for each S tile (row s*tS-1; tile 0 uses `state` instead).
    prev_idx = jnp.maximum(jnp.arange(ns) * tS - 1, 0)
    x_prev = x2[prev_idx][:, None, :]                        # (ns, 1, H)

    # Stream weights in stored torch layout; bf16 halves HBM traffic.
    # (In a real model the weights should already live in bf16 in HBM.)
    kw = key_w.astype(compute_dtype)                         # (I, H)
    vw = value_w.astype(compute_dtype)                       # (H, I)

    itm_c = jnp.dtype(compute_dtype).itemsize
    itm_x = jnp.dtype(x.dtype).itemsize
    est = (2 * (tS * H * itm_x + tI * H * itm_c + H * tI * itm_c
                + tS * H * itm_x + H * itm_x + 4 * H * 4)
           + tS * H * itm_c + tS * H * 4)
    vmem_limit = int(min(max(2 * est + (16 << 20), 32 << 20), 120 << 20))

    cost = pl.CostEstimate(
        flops=4 * S * H * I,
        transcendentals=S,
        bytes_accessed=(kw.size + vw.size) * itm_c + 2 * S * H * itm_x)

    out, state_out_all = pl.pallas_call(
        functools.partial(rwkv7_ffn_kernel, compute_dtype=compute_dtype),
        out_shape=(jax.ShapeDtypeStruct((S, H), x.dtype),
                   jax.ShapeDtypeStruct((ns, 1, H), x.dtype)),
        grid=(ns, nk),
        in_specs=[
            pl.BlockSpec((tS, H), lambda s, k: (s, 0)),        # x tile
            pl.BlockSpec((1, 1, H), lambda s, k: (s, 0, 0)),   # prev raw x row
            pl.BlockSpec((4, H), lambda s, k: (0, 0)),         # packed params
            pl.BlockSpec((tI, H), lambda s, k: (k, 0)),        # key.weight tile
            pl.BlockSpec((H, tI), lambda s, k: (0, k)),        # value.weight tile
        ],
        out_specs=(pl.BlockSpec((tS, H), lambda s, k: (s, 0)),
                   pl.BlockSpec((1, 1, H), lambda s, k: (s, 0, 0))),
        scratch_shapes=[pltpu.VMEM((tS, H), compute_dtype),    # xk (resident over I)
                        pltpu.VMEM((tS, H), jnp.float32)],     # f32 accumulator
        compiler_params=pltpu.CompilerParams(
            dimension_semantics=("parallel", "arbitrary"),
            vmem_limit_bytes=vmem_limit),
        cost_estimate=cost,
    )(x2, x_prev, params, kw, vw)

    return out[None], state_out_all[-1][None]                 # (1,S,H), (1,1,H)


def ref_forward(x, state, x_k, ln_w, ln_b, key_w, value_w):
    """Pure-JAX f32 reference mirroring the PyTorch forward (default path, B=1)."""
    last_x = x
    mean = jnp.mean(x, axis=-1, keepdims=True)
    var = jnp.mean((x - mean) ** 2, axis=-1, keepdims=True)
    xn = (x - mean) / jnp.sqrt(var + 1e-5) * ln_w + ln_b
    state_out = xn[:, -1:]
    past = jnp.concatenate([state.reshape(1, 1, -1), xn[:, :-1]], axis=1)
    sx = past - xn
    xk = xn + sx * x_k.reshape(1, 1, -1)
    k = jnp.maximum(xk @ key_w.T, 0.0) ** 2
    v = k @ value_w.T
    return last_x + v, state_out


if __name__ == "__main__":
    # Small shapes, but chosen so both grid axes are exercised:
    #   S=16 with block_s=8  -> 2 sequence tiles (token shift crosses a tile boundary)
    #   I=256 with block_i=128 -> 2 reduction steps over the accumulator
    B, S, H, I = 1, 16, 32, 256

    key = jax.random.PRNGKey(0)
    ks = jax.random.split(key, 7)
    x = jax.random.normal(ks[0], (B, S, H), dtype=jnp.float32)
    state = jax.random.normal(ks[1], (B, H), dtype=jnp.float32)
    x_k = jax.random.uniform(ks[2], (1, 1, H), dtype=jnp.float32)
    ln_w = 1.0 + 0.1 * jax.random.normal(ks[3], (H,), dtype=jnp.float32)
    ln_b = 0.1 * jax.random.normal(ks[4], (H,), dtype=jnp.float32)
    key_w = 0.05 * jax.random.normal(ks[5], (I, H), dtype=jnp.float32)     # torch Linear: (out, in)
    value_w = 0.05 * jax.random.normal(ks[6], (H, I), dtype=jnp.float32)

    out, state_out = rwkv7_ffn(x, state, x_k, ln_w, ln_b, key_w, value_w,
                               block_s=8, block_i=128)
    jax.block_until_ready((out, state_out))

    ref_out, ref_state_out = ref_forward(x, state, x_k, ln_w, ln_b, key_w, value_w)
    assert out.shape == (B, S, H) and state_out.shape == (B, 1, H)
    # Matmuls run in bf16 (f32 accumulate) -> compare against f32 ref loosely.
    assert jnp.allclose(out, ref_out, rtol=1e-2, atol=1e-2), \
        float(jnp.max(jnp.abs(out - ref_out)))
    # state_out is pure f32 LayerNorm -> tight check.
    assert jnp.allclose(state_out, ref_state_out, rtol=1e-4, atol=1e-4)

    print("KERNEL_OK")
</pallas_src>

<mosaic_0001>
module attributes {stable_mosaic.version = 11 : i64} {
  func.func @rwkv7_ffn_kernel(%arg0: i32, %arg1: i32, %arg2: memref<8x32xf32, #tpu.memory_space<vmem>>, %arg3: memref<1x1x32xf32, #tpu.memory_space<vmem>>, %arg4: memref<4x32xf32, #tpu.memory_space<vmem>>, %arg5: memref<128x32xbf16, #tpu.memory_space<vmem>>, %arg6: memref<32x128xbf16, #tpu.memory_space<vmem>>, %arg7: memref<8x32xf32, #tpu.memory_space<vmem>>, %arg8: memref<1x1x32xf32, #tpu.memory_space<vmem>>, %arg9: memref<8x32xbf16, #tpu.memory_space<vmem>>, %arg10: memref<8x32xf32, #tpu.memory_space<vmem>>) attributes {dimension_semantics = [#tpu.dimension_semantics<parallel>, #tpu.dimension_semantics<arbitrary>], iteration_bounds = array<i64: 2, 2>, scalar_prefetch = 0 : i64, scratch_operands = 2 : i64, tpu.core_type = #tpu.core_type<tc>, window_params = [{transform_indices = @transform_0, window_bounds = array<i64: 8, 32>}, {transform_indices = @transform_1, window_bounds = array<i64: 1, 1, 32>}, {pipeline_mode = #tpu.pipeline_mode<synchronous>, transform_indices = @transform_2, window_bounds = array<i64: 4, 32>}, {transform_indices = @transform_3, window_bounds = array<i64: 128, 32>}, {transform_indices = @transform_4, window_bounds = array<i64: 32, 128>}, {transform_indices = @transform_5, window_bounds = array<i64: 8, 32>}, {transform_indices = @transform_6, window_bounds = array<i64: 1, 1, 32>}]} {
    %c0_i32 = arith.constant 0 : i32
    %0 = arith.cmpi eq, %arg1, %c0_i32 : i32
    %1 = arith.extui %0 : i1 to i32
    %c0_i32_0 = arith.constant 0 : i32
    %2 = arith.cmpi ne, %1, %c0_i32_0 : i32
    scf.if %2 {
      %c0_13 = arith.constant 0 : index
      %c0_14 = arith.constant 0 : index
      %18 = vector.load %arg2[%c0_13, %c0_14] : memref<8x32xf32, #tpu.memory_space<vmem>>, vector<8x32xf32>
      %c0_15 = arith.constant 0 : index
      %c0_16 = arith.constant 0 : index
      %19 = vector.load %arg4[%c0_15, %c0_16] : memref<4x32xf32, #tpu.memory_space<vmem>>, vector<1x32xf32>
      %c1 = arith.constant 1 : index
      %c0_17 = arith.constant 0 : index
      %20 = vector.load %arg4[%c1, %c0_17] : memref<4x32xf32, #tpu.memory_space<vmem>>, vector<1x32xf32>
      %c2 = arith.constant 2 : index
      %c0_18 = arith.constant 0 : index
      %21 = vector.load %arg4[%c2, %c0_18] : memref<4x32xf32, #tpu.memory_space<vmem>>, vector<1x32xf32>
      %c3 = arith.constant 3 : index
      %c0_19 = arith.constant 0 : index
      %22 = vector.load %arg4[%c3, %c0_19] : memref<4x32xf32, #tpu.memory_space<vmem>>, vector<1x32xf32>
      %cst_20 = arith.constant dense<0.000000e+00> : vector<8xf32>
      %23 = vector.multi_reduction <add>, %18, %cst_20 [1] : vector<8x32xf32> to vector<8xf32>
      %24 = vector.shape_cast %23 : vector<8xf32> to vector<8x1xf32>
      %cst_21 = arith.constant 3.200000e+01 : f32
      %25 = vector.broadcast %cst_21 : f32 to vector<8x1xf32>
      %26 = arith.divf %24, %25 : vector<8x1xf32>
      %27 = vector.broadcast %26 : vector<8x1xf32> to vector<8x32xf32>
      %28 = arith.subf %18, %27 : vector<8x32xf32>
      %29 = arith.mulf %28, %28 : vector<8x32xf32>
      %cst_22 = arith.constant dense<0.000000e+00> : vector<8xf32>
      %30 = vector.multi_reduction <add>, %29, %cst_22 [1] : vector<8x32xf32> to vector<8xf32>
      %31 = vector.shape_cast %30 : vector<8xf32> to vector<8x1xf32>
      %cst_23 = arith.constant 3.200000e+01 : f32
      %32 = vector.broadcast %cst_23 : f32 to vector<8x1xf32>
      %33 = arith.divf %31, %32 : vector<8x1xf32>
      %cst_24 = arith.constant 9.99999974E-6 : f32
      %34 = vector.broadcast %cst_24 : f32 to vector<8x1xf32>
      %35 = arith.addf %33, %34 : vector<8x1xf32>
      %36 = math.rsqrt %35 : vector<8x1xf32>
      %37 = vector.broadcast %36 : vector<8x1xf32> to vector<8x32xf32>
      %38 = arith.mulf %28, %37 : vector<8x32xf32>
      %39 = vector.broadcast %21 : vector<1x32xf32> to vector<8x32xf32>
      %40 = arith.mulf %38, %39 : vector<8x32xf32>
      %41 = vector.broadcast %22 : vector<1x32xf32> to vector<8x32xf32>
      %42 = arith.addf %40, %41 : vector<8x32xf32>
      %c1_i32_25 = arith.constant 1 : i32
      %43 = tpu.dynamic_rotate %42 by %c1_i32_25 dim 0 : vector<8x32xf32>, i32 -> vector<8x32xf32>
      %c0_26 = arith.constant 0 : index
      %c0_27 = arith.constant 0 : index
      %c0_28 = arith.constant 0 : index
      %44 = vector.load %arg3[%c0_26, %c0_27, %c0_28] : memref<1x1x32xf32, #tpu.memory_space<vmem>>, vector<1x1x32xf32>
      %45 = vector.shape_cast %44 : vector<1x1x32xf32> to vector<1x32xf32>
      %c0_i32_29 = arith.constant 0 : i32
      %46 = arith.cmpi eq, %arg0, %c0_i32_29 : i32
      %cst_30 = arith.constant dense<0.000000e+00> : vector<1xf32>
      %47 = vector.multi_reduction <add>, %45, %cst_30 [1] : vector<1x32xf32> to vector<1xf32>
      %48 = vector.shape_cast %47 : vector<1xf32> to vector<1x1xf32>
      %cst_31 = arith.constant 3.200000e+01 : f32
      %49 = vector.broadcast %cst_31 : f32 to vector<1x1xf32>
      %50 = arith.divf %48, %49 : vector<1x1xf32>
      %51 = vector.broadcast %50 : vector<1x1xf32> to vector<1x32xf32>
      %52 = arith.subf %45, %51 : vector<1x32xf32>
      %53 = arith.mulf %52, %52 : vector<1x32xf32>
      %cst_32 = arith.constant dense<0.000000e+00> : vector<1xf32>
      %54 = vector.multi_reduction <add>, %53, %cst_32 [1] : vector<1x32xf32> to vector<1xf32>
      %55 = vector.shape_cast %54 : vector<1xf32> to vector<1x1xf32>
      %cst_33 = arith.constant 3.200000e+01 : f32
      %56 = vector.broadcast %cst_33 : f32 to vector<1x1xf32>
      %57 = arith.divf %55, %56 : vector<1x1xf32>
      %cst_34 = arith.constant 9.99999974E-6 : f32
      %58 = vector.broadcast %cst_34 : f32 to vector<1x1xf32>
      %59 = arith.addf %57, %58 : vector<1x1xf32>
      %60 = math.rsqrt %59 : vector<1x1xf32>
      %61 = vector.broadcast %60 : vector<1x1xf32> to vector<1x32xf32>
      %62 = arith.mulf %52, %61 : vector<1x32xf32>
      %63 = arith.mulf %62, %21 : vector<1x32xf32>
      %64 = arith.addf %63, %22 : vector<1x32xf32>
      %65 = arith.select %46, %19, %64 : vector<1x32xf32>
      %66 = tpu.iota {dimensions = array<i32: 0>} : vector<8x32xi32>
      %c0_i32_35 = arith.constant 0 : i32
      %67 = vector.broadcast %c0_i32_35 : i32 to vector<8x32xi32>
      %68 = arith.cmpi eq, %66, %67 : vector<8x32xi32>
      %69 = vector.shape_cast %65 : vector<1x32xf32> to vector<1x32xf32>
      %70 = vector.broadcast %69 : vector<1x32xf32> to vector<8x32xf32>
      %71 = arith.select %68, %70, %43 : vector<8x32xi1>, vector<8x32xf32>
      %72 = arith.subf %71, %42 : vector<8x32xf32>
      %73 = vector.broadcast %20 : vector<1x32xf32> to vector<8x32xf32>
      %74 = arith.mulf %72, %73 : vector<8x32xf32>
      %75 = arith.addf %42, %74 : vector<8x32xf32>
      %76 = arith.truncf %75 : vector<8x32xf32> to vector<8x32xbf16>
      %c0_36 = arith.constant 0 : index
      %c0_37 = arith.constant 0 : index
      %77 = vector.load %arg9[%c0_36, %c0_37] : memref<8x32xbf16, #tpu.memory_space<vmem>>, vector<8x32xbf16>
      tpu.vector_store %arg9[%c0_36, %c0_37], %76 {strides = array<i32>} : memref<8x32xbf16, #tpu.memory_space<vmem>>, vector<8x32xbf16>,
      %c0_38 = arith.constant 0 : index
      %c0_39 = arith.constant 0 : index
      %78 = vector.load %arg10[%c0_38, %c0_39] : memref<8x32xf32, #tpu.memory_space<vmem>>, vector<8x32xf32>
      tpu.vector_store %arg10[%c0_38, %c0_39], %18 {strides = array<i32>} : memref<8x32xf32, #tpu.memory_space<vmem>>, vector<8x32xf32>,
      %79 = vector.extract_strided_slice %42 {offsets = [7, 0], sizes = [1, 32], strides = [1, 1]} : vector<8x32xf32> to vector<1x32xf32>
      %c0_40 = arith.constant 0 : index
      %c0_41 = arith.constant 0 : index
      %c0_42 = arith.constant 0 : index
      %80 = vector.load %arg8[%c0_40, %c0_41, %c0_42] : memref<1x1x32xf32, #tpu.memory_space<vmem>>, vector<1x1x32xf32>
      %81 = vector.shape_cast %80 : vector<1x1x32xf32> to vector<1x32xf32>
      %82 = vector.shape_cast %79 : vector<1x32xf32> to vector<1x1x32xf32>
      tpu.vector_store %arg8[%c0_40, %c0_41, %c0_42], %82 {strides = array<i32>} : memref<1x1x32xf32, #tpu.memory_space<vmem>>, vector<1x1x32xf32>,
    } else {
    }
    %c0 = arith.constant 0 : index
    %c0_1 = arith.constant 0 : index
    %3 = vector.load %arg9[%c0, %c0_1] : memref<8x32xbf16, #tpu.memory_space<vmem>>, vector<8x32xbf16>
    %c0_2 = arith.constant 0 : index
    %c0_3 = arith.constant 0 : index
    %4 = vector.load %arg5[%c0_2, %c0_3] : memref<128x32xbf16, #tpu.memory_space<vmem>>, vector<128x32xbf16>
    %c0_4 = arith.constant 0 : index
    %c0_5 = arith.constant 0 : index
    %5 = vector.load %arg6[%c0_4, %c0_5] : memref<32x128xbf16, #tpu.memory_space<vmem>>, vector<32x128xbf16>
    %cst = arith.constant dense<0.000000e+00> : vector<8x128xf32>
    %6 = tpu.matmul %3, %4, %cst {dimension_numbers = #tpu.dot_dimension_numbers<[1], [1], [0], [0], [0, 0, 1, 0], [], []>} : vector<8x32xbf16>, vector<128x32xbf16>, vector<8x128xf32> -> vector<8x128xf32>
    %cst_6 = arith.constant 0.000000e+00 : f32
    %7 = vector.broadcast %cst_6 : f32 to vector<8x128xf32>
    %8 = arith.maximumf %6, %7 : vector<8x128xf32>
    %9 = arith.mulf %8, %8 : vector<8x128xf32>
    %10 = arith.truncf %9 : vector<8x128xf32> to vector<8x128xbf16>
    %cst_7 = arith.constant dense<0.000000e+00> : vector<8x32xf32>
    %11 = tpu.matmul %10, %5, %cst_7 {dimension_numbers = #tpu.dot_dimension_numbers<[1], [1], [0], [0], [0, 0, 1, 0], [], []>} : vector<8x128xbf16>, vector<32x128xbf16>, vector<8x32xf32> -> vector<8x32xf32>
    %c0_8 = arith.constant 0 : index
    %c0_9 = arith.constant 0 : index
    %12 = vector.load %arg10[%c0_8, %c0_9] : memref<8x32xf32, #tpu.memory_space<vmem>>, vector<8x32xf32>
    %13 = arith.addf %12, %11 : vector<8x32xf32>
    %c0_10 = arith.constant 0 : index
    %c0_11 = arith.constant 0 : index
    %14 = vector.load %arg10[%c0_10, %c0_11] : memref<8x32xf32, #tpu.memory_space<vmem>>, vector<8x32xf32>
    tpu.vector_store %arg10[%c0_10, %c0_11], %13 {strides = array<i32>} : memref<8x32xf32, #tpu.memory_space<vmem>>, vector<8x32xf32>,
    %c1_i32 = arith.constant 1 : i32
    %15 = arith.cmpi eq, %arg1, %c1_i32 : i32
    %16 = arith.extui %15 : i1 to i32
    %c0_i32_12 = arith.constant 0 : i32
    %17 = arith.cmpi ne, %16, %c0_i32_12 : i32
    scf.if %17 {
      %c0_13 = arith.constant 0 : index
      %c0_14 = arith.constant 0 : index
      %18 = vector.load %arg10[%c0_13, %c0_14] : memref<8x32xf32, #tpu.memory_space<vmem>>, vector<8x32xf32>
      %c0_15 = arith.constant 0 : index
      %c0_16 = arith.constant 0 : index
      %19 = vector.load %arg7[%c0_15, %c0_16] : memref<8x32xf32, #tpu.memory_space<vmem>>, vector<8x32xf32>
      tpu.vector_store %arg7[%c0_15, %c0_16], %18 {strides = array<i32>} : memref<8x32xf32, #tpu.memory_space<vmem>>, vector<8x32xf32>,
    } else {
    }
    return
  }
  func.func @transform_0(%arg0: i32, %arg1: i32) -> (i32, i32) {
    %c0_i32 = arith.constant 0 : i32
    %c0_i32_0 = arith.constant 0 : i32
    return %arg0, %c0_i32 : i32, i32
  }
  func.func @transform_1(%arg0: i32, %arg1: i32) -> (i32, i32, i32) {
    %c0_i32 = arith.constant 0 : i32
    %c0_i32_0 = arith.constant 0 : i32
    %c0_i32_1 = arith.constant 0 : i32
    return %arg0, %c0_i32, %c0_i32_0 : i32, i32, i32
  }
  func.func @transform_2(%arg0: i32, %arg1: i32) -> (i32, i32) {
    %c0_i32 = arith.constant 0 : i32
    %c0_i32_0 = arith.constant 0 : i32
    %c0_i32_1 = arith.constant 0 : i32
    return %c0_i32, %c0_i32_0 : i32, i32
  }
  func.func @transform_3(%arg0: i32, %arg1: i32) -> (i32, i32) {
    %c0_i32 = arith.constant 0 : i32
    %c0_i32_0 = arith.constant 0 : i32
    return %arg1, %c0_i32 : i32, i32
  }
  func.func @transform_4(%arg0: i32, %arg1: i32) -> (i32, i32) {
    %c0_i32 = arith.constant 0 : i32
    %c0_i32_0 = arith.constant 0 : i32
    return %c0_i32, %arg1 : i32, i32
  }
  func.func @transform_5(%arg0: i32, %arg1: i32) -> (i32, i32) {
    %c0_i32 = arith.constant 0 : i32
    %c0_i32_0 = arith.constant 0 : i32
    return %arg0, %c0_i32 : i32, i32
  }
  func.func @transform_6(%arg0: i32, %arg1: i32) -> (i32, i32, i32) {
    %c0_i32 = arith.constant 0 : i32
    %c0_i32_0 = arith.constant 0 : i32
    %c0_i32_1 = arith.constant 0 : i32
    return %arg0, %c0_i32, %c0_i32_0 : i32, i32, i32
  }
}

</mosaic_0001>

<bundles_post_ra>
// kernel: tpu_custom_call.1
= control target key start
LH: loop header
LB: loop body
LE: loop exit
PB: predicated region body
PF: predicated region fallthrough
CT: control target
= control target key end

     0   :  { %s1434_s0 = inlined_call_operand.vmem [shape: f32[16,32], index: 0, kind: input, shape index: {}]   ;;  %s1435_s1 = inlined_call_operand.vmem [shape: f32[2,1,32], index: 1, kind: input, shape index: {}]   ;;  %s1436_s2 = inlined_call_operand.vmem [shape: f32[4,32], index: 2, kind: input, shape index: {}]   ;;  %s1437_s3 = inlined_call_operand.vmem [shape: bf16[256,32], index: 3, kind: input, shape index: {}]   ;;  %s1438_s4 = inlined_call_operand.vmem [shape: bf16[32,256], index: 4, kind: input, shape index: {}]   ;;  %s1439_s5 = inlined_call_operand.hbm [shape: f32[16,32], index: 5, kind: output, shape index: {0}]   ;;  %s1440_s6 = inlined_call_operand.hbm [shape: f32[2,1,32], index: 6, kind: output, shape index: {1}]  }
   0x1   :  { %1448 = sst [smem:[#allocation20_spill]] %s1438_s4 }
   0x2   :  { %12 = vsyncpa [#allocation6], 0 }
   0x3   :  { %14 = vsyncpa [#allocation6 + $0x1], 0 }
   0x4   :  { %15 = vsyncpa [#allocation8], 0 }
   0x5   :  { %17 = vsyncpa [#allocation8 + $0x1], 0  ;;  %s1180_s21 = smov 0   ;;  %s1182_s22 = smov 0  }
   0x6   :  { %s1184_s23 = smov 0   ;;  %s1186_s24 = smov 0  }
   0x7   :  { %s1188_s25 = smov 0   ;;  %s1190_s26 = smov 0  }
   0x8   :  { %s1192_s27 = smov 0   ;;  %s1194_s28 = smov 0  }
   0x9   :  { %s1196_s29 = smov 0   ;;  %s1198_s30 = smov 0  }
   0xa LB: > { %1449 = sst [smem:[#allocation11_spill]] %s1107_s22  ;;  %s818_s7 = sadd.s32 4294967295, %s1139_s30   ;;  %s1139_s30 = sphi %s1198_s30, %s23_s30   ;;  %s1135_s29 = sphi %s1196_s29, %s1470_s29   ;;  %s1131_s28 = sphi %s1194_s28, %s1469_s28   ;;  %s1127_s27 = sphi %s1192_s27, %s1468_s27   ;;  %s1123_s26 = sphi %s1190_s26, %s1467_s26   ;;  %s1119_s25 = sphi %s1188_s25, %s1466_s25   ;;  %s1115_s24 = sphi %s1186_s24, %s1465_s24   ;;  %s1111_s23 = sphi %s1184_s23, %s1464_s23   ;;  %s1107_s22 = sphi %s1182_s22, %s1463_s22   ;;  %s1103_s21 = sphi %s1180_s21, %s1462_s21  }
   0xb   : > { %1450 = sst [smem:[#allocation12_spill]] %s1111_s23  ;;  %s819_s8 = sadd.s32 4294967294, %s1139_s30  }
   0xc   : > { %1451 = sst [smem:[#allocation13_spill]] %s1119_s25  ;;  %s32_s9 = sadd.s32 1, %s1131_s28 }
   0xd   : > { %1452 = sst [smem:[#allocation14_spill]] %s1131_s28  ;;  %s35_s10 = sadd.s32 1, %s1135_s29 }
   0xe   : > { %1453 = sst [smem:[#allocation15_spill]] %s1135_s29  ;;  %p33_p0 = scmp.ge.s32.totalorder %s32_s9, 2 }
   0xf   : > { %s141_s11 = sadd.s32 1, %s1119_s25  ;;  %p148_p1 = scmp.ne.s32.totalorder %s1119_s25, %s1115_s24 }
  0x10   : > { %p149_p2 = scmp.eq.s32.totalorder %s1139_s30, 0  ;;  %s1472_s9 = smov (%p33_p0, %s32_s9), 0 }
  0x11   : > { %1454 = sst [smem:[#allocation16_spill]] %s1472_s9  ;;  %s1474_s10 = smov (!%p33_p0, %s35_s10), %s1135_s29 }
  0x12   : > { %s138_s12 = ssub.s32 %s1131_s28, %s1472_s9  ;;  %p1243_p3 = por %p149_p2, %p148_p1 }
  0x13   : > { %p37_p4 = scmp.ge.s32.totalorder %s1474_s10, 2  ;;  %p139_p5 = scmp.eq.s32.totalorder %s138_s12, 0 }
  0x14   : > { %s167_s14 = sadd.s32 1, %s1111_s23  ;;  %p177_p6 = scmp.ne.s32.totalorder %s1111_s23, %s1107_s22 }
  0x15   : > { %s1476_s10 = smov (%p37_p4, %s1474_s10), 0  ;;  %p178_p7 = scmp.eq.s32.totalorder %s818_s7, 3 }
  0x16   : > { %1456 = sst [smem:[#allocation17_spill]] %s1476_s10  ;;  %s164_s16 = ssub.s32 %s1135_s29, %s1476_s10 }
  0x17   : > { %s1253_s15 = scalar_select %p139_p5, %s1119_s25, %s141_s11  }
  0x18   : > { %p165_p8 = scmp.eq.s32.totalorder %s164_s16, 0  ;;  %p183_p9 = scmp.ne.s32.totalorder %s1107_s22, %s1103_s21 }
  0x19   : > { %1457 = sst [smem:[#allocation18_spill]] %s1253_s15  ;;  %p1259_p10 = por %p178_p7, %p177_p6 }
  0x1a   : > { %p184_p11 = scmp.eq.s32.totalorder %s819_s8, 3  ;;  %p821_p13 = scmp.ge.s32.totalorder %s1139_s30, 4 }
  0x1b   : > { %s1264_s18 = scalar_select %p165_p8, %s1111_s23, %s167_s14  }
  0x1c   : > { %p1266_p12 = por %p184_p11, %p183_p9  ;;  %229 = sbr.rel (%p821_p13) target bundleno = 47 (0x2f), region = 20 }
  0x1d   : > { %1459 = sst [smem:[#allocation19_spill]] %s1264_s18 }
  0x23   : > { %254 = sbr.rel (!%p1243_p3) target bundleno = 47 (0x2f), region = 36  ;;  %s256_s20 = sand.u32 (%p1243_p3), 1, %s1119_s25  }
  0x24   : > { %s823_s7 = sshll.u32 (%p1243_p3), %s1131_s28, 2  ;;  %s822_s11 = sshll.u32 (%p1243_p3), %s256_s20, 4 }
  0x25   : > { %s1461_s4 = sld [smem:[#allocation20_spill]] (%p1243_p3)  ;;  %s258_s14 = scalar_lea.vmem (%p1243_p3), [#allocation4], %s822_s11 }
  0x2b   : > { %s260_s8 = scalar_lea.vmem %s1461_s4, %s823_s7 }
  0x2c   : > { %v276_v0 = vld [vmem:[%s260_s8] sm:$0xf]  ;;  %v278_v1 = vld [vmem:[%s260_s8 + $0x8] sm:$0xf]  ;;  %v280_v2 = vld [vmem:[%s260_s8 + $0x10] sm:$0xf] }
  0x2d   : > { %277 = vst [vmem:[%s258_s14] sm:$0xf] %v276_v0  ;;  %279 = vst [vmem:[%s258_s14 + $0x4] sm:$0xf] %v278_v1  ;;  %v282_v3 = vld [vmem:[%s260_s8 + $0x18] sm:$0xf] }
  0x2e   : > { %281 = vst [vmem:[%s258_s14 + $0x8] sm:$0xf] %v280_v2  ;;  %283 = vst [vmem:[%s258_s14 + $0xc] sm:$0xf] %v282_v3 }
  0x2f PF: > { %p824_p0 = scmp.ge.s32.totalorder %s1139_s30, 1  ;;  %p313_p1 = scmp.lt.s32.totalorder %s1139_s30, 5 }
  0x31   : > { %p314_p2 = pnand %p824_p0, %p313_p1 }
  0x32   : > { %s320_s13 = sand.u32 (!%p314_p2), 1, %s1115_s24   ;;  %s1282_s20 = sand.u32 (!%p314_p2), 1, %s1107_s22  }
  0x33   : > { %317 = sbr.rel (%p314_p2) target bundleno = 945 (0x3b1), region = 77  ;;  %s1284_s7 = sshll.u32 (!%p314_p2), %s320_s13, 4 }
  0x34   : > { %s826_s11 = sshll.u32 (!%p314_p2), %s1282_s20, 3  ;;  %p365_p3 = scmp.lt.s32.totalorder (!%p314_p2), %s1127_s27, 1 }
  0x35   : > { %s828_s12 = sshll.u32 (!%p314_p2), %s1123_s26, 4  ;;  %s322_s18 = scalar_lea.vmem (!%p314_p2), [#allocation4], %s1284_s7 }
  0x36   : > { %p373_p4 = scmp.lt.s32.totalorder (!%p314_p2), %s828_s12, 31  ;;  %s1302_s23 = scalar_lea.vmem (!%p314_p2), [#allocation5], %s826_s11 }
  0x37   : > { %s364_s22 = scalar_lea.vmem (!%p314_p2), [#allocation7], %s1282_s20  ;;  %p830_p5 = scmp.ne.s32.totalorder (!%p314_p2), %s1123_s26, 0 }
  0x3a   : > { %s366_s16 = scalar_select %p365_p3, %s1127_s27, 1 }
  0x3b   : > { %s1478_s12 = smov (!%p373_p4, %s828_s12), 31  ;;  %382 = sbr.rel (%p830_p5) target bundleno = 391 (0x187), region = 85 }
  0x3c   : > { %s827_s8 = sshll.u32 %s366_s16, 3  ;;  %s371_s10 = scalar_lea.vmem %s1435_s1, %s366_s16  ;;  %vm416_vm0 = vcmask (!%p830_p5), 253952   ;;  %vm388_vm1 = vcmask (!%p830_p5), 261120   ;;  %v403_v23 = vlaneseq (!%p830_p5)  ;;  %v386_v28 = vld [vmem:[%s1436_s2 + $0x2] sm:$0x1] (!%p830_p5)  ;;  %vm455_vm3 = vcmask (!%p830_p5), 261127  }
  0x3d   : > { %s368_s24 = scalar_lea.vmem %s1434_s0, %s827_s8  ;;  %s829_s28 = sshll.u32 %s1478_s12, 2  ;;  %v414_v4 = vld [vmem:[%s371_s10] sm:$0x1] (!%p830_p5)  ;;  %v387_v31 = vld [vmem:[%s1436_s2 + $0x3] sm:$0x1] (!%p830_p5)  ;;  %vm452_vm5 = vcmask (!%p830_p5), 257024  }
  0x3e   : > { %s1299_s25 = scalar_lea.vmem %s1437_s3, %s829_s28  ;;  %v383_v5 = vld [vmem:[%s368_s24] sm:$0xff] (!%p830_p5)  ;;  %v417_v6 = vsel (!%p830_p5), %vm416_vm0, %v414_v4, 0.0  ;;  %p415_p6 = scmp.eq.s32.totalorder (!%p830_p5), %s1127_s27, 0  ;;  %v404_v25 = vshrl.u32 (!%p830_p5), %v403_v23, 7 }
  0x3f   : > { %454 = vst.msk [vmem:[#allocation3] sm:$0xff] (!%p830_p5), %vm388_vm1, %v383_v5  ;;  %418 = vadd.xlane.f32.xlu0 (!%p830_p5), %v417_v6  ;;  %v389_v7 = vsel (!%p830_p5), %vm388_vm1, %v383_v5, 0.0  ;;  %v384_v35 = vld [vmem:[%s1436_s2] sm:$0x1] (!%p830_p5)  ;;  %v831_v44 = vld [vmem:[%s1436_s2 + $0x1] ss:$0 sm:$0xff] (!%p830_p5) }
  0x40   : > { %v405_v26 = vsub.s32 (!%p830_p5), 0, %v404_v25  ;;  %vm438_vm4 = vcmp.eq.s32.totalorder (!%p830_p5), %v404_v25, 0 }
  0x42   : > { %s432_s4 = scalar_select %p415_p6, 1, 0  ;;  %v406_v33 = vrot.slane %v386_v28, %v405_v26  ;;  %v411_v37 = vrot.slane %v387_v31, %v405_v26 }
  0x43   : > { %390 = vadd.xlane.f32.xlu0 %v389_v7 }
  0x44   : > { %v433_v30 = vstv %s432_s4 }
  0x45   : > { %vm434_vm2 = vcmp.eq.s32.totalorder %v433_v30, 1 }
  0xcc   : > { %v419_v8 = vpop.xlane.xlu0 %418 }
  0xcd   : > { %v420_v9 = vmul.f32 0.03125, %v419_v8 }
  0xcf   : > { %v421_v10 = vsub.f32 %v414_v4, %v420_v9 }
  0xd0   : > { %v391_v11 = vpop.xlane.xlu0 %390 }
  0xd1   : > { %v393_v12 = vmul.f32 0.03125, %v391_v11  ;;  %v422_v13 = vmul.f32 %v421_v10, %v421_v10 }
  0xd3   : > { %v394_v14 = vsub.f32 %v383_v5, %v393_v12  ;;  %v423_v15 = vsel %vm416_vm0, %v422_v13, 0.0 }
  0xd4   : > { %424 = vadd.xlane.f32.xlu1 %v423_v15 }
  0xd5   : > { %v395_v16 = vmul.f32 %v394_v14, %v394_v14 }
  0xd7   : > { %v396_v17 = vsel %vm388_vm1, %v395_v16, 0.0 }
  0xd8   : > { %397 = vadd.xlane.f32.xlu1 %v396_v17 }
 0x161   : > { %v425_v18 = vpop.xlane.xlu1 %424 }
 0x162   : > { %v426_v19 = vmul.f32 0.03125, %v425_v18 }
 0x164   : > { %v427_v20 = vadd.f32 1e-05, %v426_v19 }
 0x165   : > { %v398_v21 = vpop.xlane.xlu1 %397 }
 0x166   : > { %983 = vrsqrt.f32 %v427_v20  ;;  %v399_v22 = vmul.f32 0.03125, %v398_v21 }
 0x168   : > { %v400_v24 = vadd.f32 1e-05, %v399_v22 }
 0x16a   : > { %985 = vrsqrt.f32 %v400_v24 }
 0x170   : > { %v984_v27 = vpop.eup %983 }
 0x171   : > { %v429_v29 = vmul.f32 %v984_v27, %v421_v10 }
 0x173   : > { %v430_v32 = vmul.f32 %v429_v29, %v386_v28 }
 0x174   : > { %v986_v34 = vpop.eup %985 }
 0x175   : > { %v431_v36 = vadd.f32 %v430_v32, %v387_v31  ;;  %v402_v38 = vmul.f32 %v986_v34, %v394_v14 }
 0x177   : > { %v407_v39 = vmul.f32 %v406_v33, %v402_v38  ;;  %v435_v40 = vsel %vm434_vm2, %v384_v35, %v431_v36 }
 0x178   : > { %v442_v42 = vrot.slane %v435_v40, %v405_v26 }
 0x179   : > { %v412_v41 = vadd.f32 %v411_v37, %v407_v39 }
 0x17b   : > { %v413_v43 = vrot.slane %v412_v41, 7  ;;  %456 = vst.msk [vmem:[%s364_s22 - $0x7] sm:$0x80] %vm455_vm3, %v412_v41 }
 0x17d   : > { %v443_v45 = vsel %vm438_vm4, %v442_v42, %v413_v43 }
 0x17e   : > { %v444_v46 = vsub.f32 %v443_v45, %v412_v41 }
 0x180   : > { %v449_v47 = vmul.f32 %v831_v44, %v444_v46 }
 0x182   : > { %v450_v48 = vadd.f32 %v449_v47, %v412_v41 }
 0x184   : > { %v451_v49 = vpack.c.bf16 %v450_v48, %v450_v48 }
 0x186   : > { %453 = vst.msk [vmem:[#allocation2] sm:$0xf] %vm452_vm5, %v451_v49 }
 0x187 PF: > { %v987_v50 = vld [vmem:[%s1299_s25] sm:$0xff]   ;;  %v1141_v51 = vmov 0.0   ;;  %vm518_vm6 = vcmask 261120   ;;  %v988_v53 = vld [vmem:[%s1299_s25 + $0x8] sm:$0xff]   ;;  %vm1142_vm7 = vmmov 0   ;;  %v989_v56 = vld [vmem:[%s1299_s25 + $0x10] sm:$0xff]  }
 0x188   : > { %861 = vmatprep.subr.bf16.mxu0 %v1141_v51  ;;  %881 = vmatprep.subr.bf16.mxu1 %v1141_v51  ;;  %v523_v52 = vsel %vm518_vm6, %v987_v50, 0  ;;  %v526_v54 = vsel %vm518_vm6, %v988_v53, 0  ;;  %v995_v55 = vld [vmem:[%s322_s18] sm:$0xff]   ;;  %v529_v57 = vsel %vm518_vm6, %v989_v56, 0  ;;  %v996_v5 = vld [vmem:[%s322_s18 + $0x8] sm:$0xff]   ;;  %p843_p7 = scmp.ne.s32.totalorder %s1123_s26, 1 }
 0x189   : > { %862 = vmatpush3.bf16.xpose.msra.mxu0 %v523_v52  ;;  %877 = vmatprep.mubr.msk.bf16.mxu0 %vm1142_vm7, %v1141_v51  ;;  %v990_v58 = vld [vmem:[%s1299_s25 + $0x18] sm:$0xff]   ;;  %v991_v60 = vld [vmem:[%s1299_s25 + $0x20] sm:$0xff]   ;;  %v992_v62 = vld [vmem:[%s1299_s25 + $0x28] sm:$0xff]  }
 0x18a   : > { %863 = vmatprep.subr.bf16.mxu0 %v1141_v51  ;;  %885 = vmatprep.mubr.msk.bf16.mxu1 %vm1142_vm7, %v1141_v51  ;;  %v532_v59 = vsel %vm518_vm6, %v990_v58, 0  ;;  %v535_v61 = vsel %vm518_vm6, %v991_v60, 0  ;;  %v538_v63 = vsel %vm518_vm6, %v992_v62, 0  ;;  %v993_v0 = vld [vmem:[%s1299_s25 + $0x30] sm:$0xff]   ;;  %v994_v2 = vld [vmem:[%s1299_s25 + $0x38] sm:$0xff]  }
 0x18b   : > { %882 = vmatpush3.bf16.xpose.msra.mxu1 %v995_v55  ;;  %v541_v1 = vsel %vm518_vm6, %v993_v0, 0  ;;  %v544_v3 = vsel %vm518_vm6, %v994_v2, 0  ;;  %v641_v13 = vld [vmem:[#allocation3] sm:$0xff] }
 0x18c   : > { %883 = vmatprep.subr.bf16.mxu1 %v1141_v51 }
 0x18d   : > { %v457_v4 = vld [vmem:[#allocation2] sm:$0xf] }
 0x191   : > { %864 = vmatpush3.bf16.xpose.msra.mxu0 %v526_v54 }
 0x192   : > { %865 = vmatprep.subr.bf16.mxu0 %v1141_v51 }
 0x193   : > { %884 = vmatpush3.bf16.xpose.msra.mxu1 %v996_v5 }
 0x199   : > { %866 = vmatpush3.bf16.xpose.msra.mxu0 %v529_v57 }
 0x19a   : > { %867 = vmatprep.subr.bf16.mxu0 %v1141_v51 }
 0x1a1   : > { %868 = vmatpush3.bf16.xpose.msra.mxu0 %v532_v59 }
 0x1a2   : > { %869 = vmatprep.subr.bf16.mxu0 %v1141_v51 }
 0x1a9   : > { %870 = vmatpush3.bf16.xpose.msra.mxu0 %v535_v61 }
 0x1aa   : > { %871 = vmatprep.subr.bf16.mxu0 %v1141_v51 }
 0x1b1   : > { %872 = vmatpush3.bf16.xpose.msra.mxu0 %v538_v63 }
 0x1b2   : > { %873 = vmatprep.subr.bf16.mxu0 %v1141_v51 }
 0x1b9   : > { %874 = vmatpush3.bf16.xpose.msra.mxu0 %v541_v1 }
 0x1ba   : > { %875 = vmatprep.subr.bf16.mxu0 %v1141_v51 }
 0x1c1   : > { %876 = vmatpush3.bf16.xpose.msra.mxu0 %v544_v3 }
 0x1c8   : > { %878 = vmatmul.mubr.msk.bf16.vlgmr.msra.gmra.mrb[0].mxu0 %vm518_vm6, %v457_v4 }
 0x29b   : > { %v580_v6 = vpop.f32.mrb[0].mxu0 }
 0x29c   : > { %v586_v7 = vmax.f32 %v580_v6, 0.0  ;;  %v879_v8 = vpop.f32.mrb[1].mxu0 }
 0x29d   : > { %v583_v9 = vpop.f32.mrb[2].mxu0 }
 0x29e   : > { %v587_v10 = vmul.f32 %v586_v7, %v586_v7  ;;  %v880_v11 = vpop.f32.mrb[3].mxu0 }
 0x2a0   : > { %v588_v12 = vpack.c.bf16 %v587_v10, %v587_v10 }
 0x2a2   : > { %886 = vmatmul.mubr.bf16.vlgmr.msra.gmra.mrb[0].mxu1 %v588_v12 }
 0x372   : > { %647 = sbr.rel (%p843_p7) target bundleno = 897 (0x381), region = 89 }
 0x375   : > { %v635_v14 = vpop.f32.mrb[0].mxu1 }
 0x376   : > { %v642_v15 = vadd.f32 %v641_v13, %v635_v14  ;;  %v887_v16 = vpop.f32.mrb[1].mxu1 }
 0x377   : > { %v638_v17 = vpop.f32.mrb[2].mxu1 }
 0x378   : > { %643 = vst.msk [vmem:[#allocation3] sm:$0xff] %vm518_vm6, %v642_v15  ;;  %v888_v18 = vpop.f32.mrb[3].mxu1 }
 0x37f   : > { %v648_v19 = vld [vmem:[#allocation3] sm:$0xff] }
 0x380   : > { %649 = vst.msk [vmem:[%s1302_s23] sm:$0xff] %vm518_vm6, %v648_v19 }
 0x381 PF: > { %s845_s25 = sshll.u32 %s1127_s27, 7  ;;  %s668_s14 = sshll.u32 %s1302_s23, 4  ;;  %s669_s14 = int_to_ptr.vmem [resolvable:$true] %s668_s14 }
 0x382   : > { %s1353_s8 = scalar_lea.hbm %s1439_s5, %s845_s25  ;;  %s651_s24 = scalar_lea.sflag [#allocation6], %s1282_s20 }
 0x383   : > { %s997_s26 = scalar_lea.vmem %s669_s14, 128  ;;  %s1143_s13 = smov [#allocation5]  }
 0x384   : > { %p998_p8 = scmp.ne.s32.totalorder %s669_s14, %s997_s26  ;;  %s1001_s4 = sshll.u32 %s1143_s13, 4  ;;  %s1002_s4 = int_to_ptr.vmem [resolvable:$false] %s1001_s4 }
 0x385   : > { %s1003_s28 = scalar_lea.vmem %s1002_s4, 256  ;;  %p1004_p13 = scmp.lt.s32.totalorder %s669_s14, %s1002_s4 }
 0x386   : > { %p999_p9 = pnand %p998_p8, %p1259_p10  ;;  %p1005_p0 = scmp.lt.s32.totalorder %s1003_s28, %s997_s26 }
 0x388   : > { %p1000_p11 = pneg %p999_p9  ;;  %p1006_p1 = por %p1005_p0, %p1004_p13 }
 0x38a   : > { %p1007_p2 = pnand %p1006_p1, %p1000_p11 }
 0x38c   : > { %1010 = shalt.err (!%p1007_p2)
}
 0x38d   : > { %s1011_s23 = scalar_lea.hbm %s1353_s8, 128  ;;  %s1015_s10 = scalar_lea.hbm %s1439_s5, 256 }
 0x38e   : > { %p1012_p3 = scmp.ne.s32.totalorder %s1353_s8, %s1011_s23  ;;  %p1016_p6 = scmp.lt.u32.totalorder %s1353_s8, %s1439_s5 }
 0x38f   : > { %p1017_p7 = scmp.lt.u32.totalorder %s1015_s10, %s1011_s23  ;;  %p1019_p9 = scmp.lt.u32.totalorder %s1011_s23, %s1353_s8 }
 0x390   : > { %p1013_p4 = pnand %p1012_p3, %p1259_p10 }
 0x391   : > { %p1018_p8 = por %p1017_p7, %p1016_p6 }
 0x392   : > { %p1014_p5 = pneg %p1013_p4 }
 0x393   : > { %p1020_p11 = por %p1019_p9, %p1018_p8 }
 0x395   : > { %p1021_p13 = pnand %p1020_p11, %p1014_p5 }
 0x397   : > { %1024 = shalt.err (!%p1021_p13)
}
 0x398   : > { %889 = dma.vmem_to_hbm [thread:$0]  (%p1259_p10), %s669_s14, 128, %s1353_s8, %s651_s24  }
 0x399   : > { %s846_s12 = sshll.u32 %s1127_s27, 4  ;;  %s681_s16 = sshll.u32 %s364_s22, 4  ;;  %s682_s16 = int_to_ptr.vmem [resolvable:$true] %s681_s16 }
 0x39a   : > { %s1380_s7 = scalar_lea.hbm %s1440_s6, %s846_s12  ;;  %s656_s26 = scalar_lea.sflag [#allocation8], %s1282_s20 }
 0x39b   : > { %s1025_s13 = scalar_lea.vmem %s682_s16, 16  ;;  %s1144_s4 = smov [#allocation7]  }
 0x39c   : > { %p1026_p0 = scmp.ne.s32.totalorder %s682_s16, %s1025_s13  ;;  %s1029_s28 = sshll.u32 %s1144_s4, 4  ;;  %s1030_s28 = int_to_ptr.vmem [resolvable:$false] %s1029_s28 }
 0x39d   : > { %s1031_s23 = scalar_lea.vmem %s1030_s28, 32  ;;  %p1032_p3 = scmp.lt.s32.totalorder %s682_s16, %s1030_s28 }
 0x39e   : > { %p1027_p1 = pnand %p1026_p0, %p1259_p10  ;;  %p1033_p4 = scmp.lt.s32.totalorder %s1031_s23, %s1025_s13 }
 0x3a0   : > { %p1028_p2 = pneg %p1027_p1  ;;  %p1034_p5 = por %p1033_p4, %p1032_p3 }
 0x3a2   : > { %p1035_p6 = pnand %p1034_p5, %p1028_p2 }
 0x3a4   : > { %1038 = shalt.err (!%p1035_p6)
}
 0x3a5   : > { %s1039_s22 = scalar_lea.hbm %s1380_s7, 16  ;;  %s1043_s8 = scalar_lea.hbm %s1440_s6, 32 }
 0x3a6   : > { %p1040_p7 = scmp.ne.s32.totalorder %s1380_s7, %s1039_s22  ;;  %p1044_p11 = scmp.lt.u32.totalorder %s1380_s7, %s1440_s6 }
 0x3a7   : > { %p1045_p13 = scmp.lt.u32.totalorder %s1043_s8, %s1039_s22  ;;  %p1047_p1 = scmp.lt.u32.totalorder %s1039_s22, %s1380_s7 }
 0x3a8   : > { %p1041_p8 = pnand %p1040_p7, %p1259_p10 }
 0x3a9   : > { %p1046_p0 = por %p1045_p13, %p1044_p11 }
 0x3aa   : > { %p1042_p9 = pneg %p1041_p8 }
 0x3ab   : > { %p1048_p2 = por %p1047_p1, %p1046_p0 }
 0x3ad   : > { %p1049_p3 = pnand %p1048_p2, %p1042_p9 }
 0x3af   : > { %1052 = shalt.err (!%p1049_p3)
}
 0x3b0   : > { %890 = dma.vmem_to_hbm [thread:$0]  (%p1259_p10), %s682_s16, 16, %s1380_s7, %s656_s26  }
 0x3b1 PF: > { %p900_p4 = scmp.ge.s32.totalorder %s1139_s30, 2  ;;  %s693_s29 = sand.u32 1, %s1103_s21  }
 0x3b2   : > { %s694_s9 = scalar_lea.sflag [#allocation6], %s693_s29 }
 0x3b3   : > { %p894_p5 = pnand %p900_p4, %p1266_p12 }
 0x3b5   : > { %1094 = dma.done.wait (!%p894_p5), %s694_s9, 128  }
 0x3b6   : > { %1096 = vsyncadd (!%p894_p5), %s694_s9, 4294967168  ;;  %s703_s10 = scalar_lea.sflag [#allocation8], %s693_s29 }
 0x3b7   : > { %1098 = dma.done.wait (!%p894_p5), %s703_s10, 16  }
 0x3b8   : > { %1100 = vsyncadd (!%p894_p5), %s703_s10, 4294967280  ;;  %s23_s30 = sadd.s32 1, %s1139_s30   ;;  %s1462_s21 = sld [smem:[#allocation11_spill]] }
 0x3b9   : > { %p20_p6 = scmp.ge.s32.totalorder %s23_s30, 6   ;;  %s1463_s22 = sld [smem:[#allocation12_spill]] }
 0x3ba   : > { %s1464_s23 = sld [smem:[#allocation19_spill]]  ;;  %s1465_s24 = sld [smem:[#allocation13_spill]] }
 0x3bb   : > { %s1466_s25 = sld [smem:[#allocation18_spill]]  ;;  %s1467_s26 = sld [smem:[#allocation14_spill]] }
 0x3bc   : > { %s1468_s27 = sld [smem:[#allocation15_spill]]  ;;  %s1469_s28 = sld [smem:[#allocation16_spill]] }
 0x3bd   : > { %s1470_s29 = sld [smem:[#allocation17_spill]]  ;;  %22 = sbr.rel (!%p20_p6) target bundleno = 10 (0xa), region = 155 }
 0x3c4   :  { %707 = vsyncpa [#allocation6], 1 }
 0x3c5   :  { %709 = vsyncpa [#allocation6 + $0x1], 1 }
 0x3c6   :  { %710 = vsyncpa [#allocation8], 1 }
 0x3c7   :  { %712 = vsyncpa [#allocation8 + $0x1], 1 }

</bundles_post_ra>
